<compile_context>
chip_gen: v7x
topology: tpu7x:2x2x1
jax: 0.10.0
libtpu: 0.0.40
codegen_flags: <defaults>
</compile_context>

<pallas_src>
import functools

import jax
import jax.numpy as jnp
from jax import lax
from jax.experimental import pallas as pl
from jax.experimental.pallas import tpu as pltpu

_ANCHOR_PAD = -2147483646    # sentinel label for padded anchor rows
_CONTRAST_PAD = -2147483647  # sentinel label for padded contrast columns
_NEG_BIG = -1e30             # pushes padded columns out of max / softmax sum


def _round_up(x, m):
    return (x + m - 1) // m * m


def _pad2d(x, rows, cols):
    pr, pc = rows - x.shape[0], cols - x.shape[1]
    if pr or pc:
        x = jnp.pad(x, ((0, pr), (0, pc)))
    return x


def _vmem_budget_bytes():
    """Generation-aware VMEM budget (v7x: 64 MiB/TC, v5e/v6e: 128 MiB)."""
    cap = 64 * 1024 * 1024                      # conservative fallback (v7x)
    try:
        cap = int(pltpu.get_tpu_info().vmem_capacity_bytes)
    except Exception:                            # query unsupported -> fallback
        pass
    return max(32 * 1024 * 1024, min(cap * 3 // 4, 112 * 1024 * 1024))


def _est_vmem_bytes(tm, tn, dp, itemsize):
    """Rough double-buffered VMEM footprint of one grid step (layout-padded)."""
    anchor = 2 * tm * dp * itemsize              # anchor tile (2 buffers)
    contrast = 2 * dp * tn * itemsize            # contrast tile (2 buffers)
    labels = 2 * tm * 128 * 4 + 2 * 8 * tn * 4   # (tm,1)/(1,tn) int32, padded
    out = 2 * tm * 128 * 4                       # (tm,1) f32 output block
    scratch = 4 * tm * 128 * 4                   # four (tm,1) f32 accumulators
    return int(1.15 * (anchor + contrast + labels + out + scratch))


def _supcon_kernel(a_ref, ct_ref, alab_ref, clab_ref, out_ref,
                   m_run, l_run, s_al, s_m, *, loss_scale, has_pad_cols):
    """One (tm, tn) anchor x contrast tile, accumulated over the tn axis."""
    tm = a_ref.shape[0]
    tn = ct_ref.shape[1]
    i = pl.program_id(0)          # anchor-row tile   ("parallel")
    j = pl.program_id(1)          # contrast-col tile ("arbitrary", reduction)

    @pl.when(j == 0)
    def _init():
        m_run[...] = jnp.full((tm, 1), -jnp.inf, dtype=jnp.float32)
        l_run[...] = jnp.zeros((tm, 1), dtype=jnp.float32)
        s_al[...] = jnp.zeros((tm, 1), dtype=jnp.float32)
        s_m[...] = jnp.zeros((tm, 1), dtype=jnp.float32)

    # [tm, Dp] x [Dp, tn] on the MXU (RHS pre-transposed, K padded to 128;
    # 1/temperature already folded into the anchor rows by the wrapper).
    adc = jnp.dot(a_ref[...], ct_ref[...],
                  preferred_element_type=jnp.float32)              # [tm, tn]

    alab = alab_ref[...]          # [tm, 1] int32
    clab = clab_ref[...]          # [1, tn] int32

    if has_pad_cols:              # statically elided when N % tn == 0
        adc = jnp.where(clab == _CONTRAST_PAD, jnp.float32(_NEG_BIG), adc)

    tile_max = jnp.max(adc, axis=1, keepdims=True)                 # [tm, 1]
    new_max = jnp.maximum(m_run[...], tile_max)
    alpha = jnp.exp(m_run[...] - new_max)

    # Exclude the self-comparison (global row == global col) from both the
    # denominator and the positive set.  Kept in-tile (one compare + select)
    # to avoid catastrophic cancellation that an epilogue exp-subtraction of
    # the (dominant) self term would cause in the denominator.
    row_ids = i * tm + lax.broadcasted_iota(jnp.int32, (tm, 1), 0)
    col_ids = j * tn + lax.broadcasted_iota(jnp.int32, (1, tn), 1)
    not_self = row_ids != col_ids                                   # [tm, tn]

    expv = jnp.where(not_self, jnp.exp(adc - new_max), 0.0)         # [tm, tn]
    posf = jnp.logical_and(alab == clab, not_self).astype(jnp.float32)

    # Online-softmax / fused-reduction updates (no [tm, tn] log_prob temp).
    l_run[...] = alpha * l_run[...] + jnp.sum(expv, axis=1, keepdims=True)
    s_al[...] = s_al[...] + jnp.sum(posf * adc, axis=1, keepdims=True)
    s_m[...] = s_m[...] + jnp.sum(posf, axis=1, keepdims=True)
    m_run[...] = new_max

    @pl.when(j == pl.num_programs(1) - 1)
    def _finalize():
        # mean_log_prob_pos = sum(m*adc)/sum(m) - max - log(sum exp(adc - max))
        # Matches PyTorch exactly, including 0/0 -> NaN when a row has no
        # positives.  log()/divide run once per row tile (epilogue only).
        mean_lp = s_al[...] / s_m[...] - m_run[...] - jnp.log(l_run[...])
        out_ref[...] = (-loss_scale) * mean_lp


def _supcon_pallas(anchor, contrast, anchor_labels, contrast_labels, *,
                   temperature, base_temperature, tile_m, tile_n):
    M, D = anchor.shape
    N = contrast.shape[0]
    itemsize = jnp.dtype(anchor.dtype).itemsize
    row_mult = 16 if itemsize <= 2 else 8

    # Hoist the 1/temperature scaling off the O(M*N) logits path: scale the
    # O(M*D) anchor rows once (in f32, then back to the compute dtype).
    anchor = (anchor.astype(jnp.float32) * (1.0 / float(temperature))
              ).astype(anchor.dtype)

    Dp = _round_up(D, 128)                  # MXU K alignment (zeros are exact)

    # Row tile: packed-sublane aligned; at least 2 row tiles when possible so
    # the "parallel" grid axis can shard across v7x's two TensorCores.
    tm = _round_up(min(tile_m, M), row_mult)
    if _round_up(M, tm) // tm < 2 and M > row_mult:
        tm = _round_up((M + 1) // 2, row_mult)

    budget = _vmem_budget_bytes()
    tn_full = _round_up(N, 128)
    if _est_vmem_bytes(tm, tn_full, Dp, itemsize) <= budget:
        # Contrast slab stays resident in VMEM: single reduction step, one DMA.
        tn = tn_full
    else:
        tn = min(_round_up(max(tile_n, 128), 128), tn_full)
        while _est_vmem_bytes(tm, tn, Dp, itemsize) > budget and tn > 128:
            tn = max(128, _round_up(tn // 2, 128))
        while _est_vmem_bytes(tm, tn, Dp, itemsize) > budget and tm > row_mult:
            tm = max(row_mult, _round_up(tm // 2, row_mult))

    M_pad = _round_up(M, tm)
    N_pad = _round_up(N, tn)

    a = _pad2d(anchor, M_pad, Dp)                                  # [M_pad, Dp]
    ct = jnp.transpose(_pad2d(contrast, N_pad, Dp))                # [Dp, N_pad]
    alab = jnp.full((M_pad,), _ANCHOR_PAD, jnp.int32).at[:M].set(
        anchor_labels.astype(jnp.int32)).reshape(M_pad, 1)
    clab = jnp.full((N_pad,), _CONTRAST_PAD, jnp.int32).at[:N].set(
        contrast_labels.astype(jnp.int32)).reshape(1, N_pad)

    kernel = functools.partial(
        _supcon_kernel,
        loss_scale=float(temperature / base_temperature),
        has_pad_cols=bool(N_pad != N))

    per_anchor = pl.pallas_call(
        kernel,
        grid=(M_pad // tm, N_pad // tn),
        in_specs=[
            pl.BlockSpec((tm, Dp), lambda i, j: (i, 0)),   # anchor rows
            pl.BlockSpec((Dp, tn), lambda i, j: (0, j)),   # contrast^T cols
            pl.BlockSpec((tm, 1), lambda i, j: (i, 0)),    # anchor labels
            pl.BlockSpec((1, tn), lambda i, j: (0, j)),    # contrast labels
        ],
        out_specs=pl.BlockSpec((tm, 1), lambda i, j: (i, 0)),
        out_shape=jax.ShapeDtypeStruct((M_pad, 1), jnp.float32),
        scratch_shapes=[
            pltpu.VMEM((tm, 1), jnp.float32),   # running max
            pltpu.VMEM((tm, 1), jnp.float32),   # running denominator
            pltpu.VMEM((tm, 1), jnp.float32),   # sum(mask * adc)
            pltpu.VMEM((tm, 1), jnp.float32),   # sum(mask)
        ],
        compiler_params=pltpu.CompilerParams(
            dimension_semantics=("parallel", "arbitrary"),
            vmem_limit_bytes=int(budget)),
    )(a, ct, alab, clab)

    # Mean over real anchors only; padded rows are dropped before the mean.
    return jnp.mean(per_anchor[:M, 0])


def _supcon_explicit_mask(anchor_feature, contrast_feature, mask,
                          anchor_count, contrast_count,
                          temperature, base_temperature):
    anchor = anchor_feature.astype(jnp.float32)
    contrast = contrast_feature.astype(jnp.float32)
    adc = (anchor @ contrast.T) / temperature
    logits = adc - lax.stop_gradient(jnp.max(adc, axis=1, keepdims=True))
    mask = jnp.tile(mask.astype(jnp.float32), (anchor_count, contrast_count))
    M, N = mask.shape
    logits_mask = 1.0 - jnp.eye(M, N, dtype=jnp.float32)
    mask = mask * logits_mask
    exp_logits = jnp.exp(logits) * logits_mask
    log_prob = logits - jnp.log(exp_logits.sum(1, keepdims=True))
    mean_log_prob_pos = (mask * log_prob).sum(1) / mask.sum(1)
    return jnp.mean(-(temperature / base_temperature) * mean_log_prob_pos)


def supcon_loss(features, labels=None, mask=None, *, temperature=0.07,
                contrast_mode='all', base_temperature=0.07,
                compute_dtype=None, tile_m=256, tile_n=2048):
    """JAX/Pallas equivalent of SupConLoss.forward (returns a scalar loss)."""
    if features.ndim < 3:
        raise ValueError('`features` needs to be [bsz, n_views, ...], '
                         'at least 3 dimensions are required')
    if features.ndim > 3:
        features = features.reshape(features.shape[0], features.shape[1], -1)
    bsz, n_views, dim = features.shape

    if labels is not None and mask is not None:
        raise ValueError('Cannot define both `labels` and `mask`')

    contrast_count = n_views
    # torch.cat(torch.unbind(features, dim=1), dim=0) -> [n_views*bsz, dim]
    contrast_feature = jnp.transpose(features, (1, 0, 2)).reshape(
        n_views * bsz, dim)

    if contrast_mode == 'one':
        anchor_feature = features[:, 0]
        anchor_count = 1
    elif contrast_mode == 'all':
        anchor_feature = contrast_feature
        anchor_count = contrast_count
    else:
        raise ValueError('Unknown mode: {}'.format(contrast_mode))

    # Pass compute_dtype=jnp.bfloat16 for full-rate MXU + halved HBM streaming
    # (most useful on v5e); f32 default keeps bit-level parity with PyTorch.
    if compute_dtype is not None:
        anchor_feature = anchor_feature.astype(compute_dtype)
        contrast_feature = contrast_feature.astype(compute_dtype)

    if mask is not None:
        # TODO(synk): arbitrary (possibly asymmetric) user masks cannot be
        # rebuilt from label equality in-kernel; this rare branch uses a
        # pure-JAX path with identical semantics.
        return _supcon_explicit_mask(anchor_feature, contrast_feature, mask,
                                     anchor_count, contrast_count,
                                     temperature, base_temperature)

    if labels is None:
        base_labels = jnp.arange(bsz, dtype=jnp.int32)   # eye(bsz) positives
    else:
        labels = jnp.asarray(labels).reshape(-1)
        if labels.shape[0] != bsz:
            raise ValueError('Num of labels does not match num of features')
        base_labels = labels.astype(jnp.int32)
    # NOTE: labels equal to the int32 padding sentinels would be misread as
    # padding; real labels are assumed to be ordinary class ids.

    anchor_labels = jnp.tile(base_labels, anchor_count)       # [M]
    contrast_labels = jnp.tile(base_labels, contrast_count)   # [N]

    return _supcon_pallas(anchor_feature, contrast_feature,
                          anchor_labels, contrast_labels,
                          temperature=temperature,
                          base_temperature=base_temperature,
                          tile_m=tile_m, tile_n=tile_n)


def _supcon_loss_ref(features, labels=None, *, temperature=0.07,
                     contrast_mode='all', base_temperature=0.07):
    """Pure-JAX reference mirroring the PyTorch code (for validation)."""
    features = features.reshape(features.shape[0], features.shape[1], -1)
    bsz, n_views, dim = features.shape
    if labels is None:
        mask = jnp.eye(bsz, dtype=jnp.float32)
    else:
        labels = labels.reshape(-1, 1)
        mask = (labels == labels.T).astype(jnp.float32)
    contrast_count = n_views
    contrast_feature = jnp.transpose(features, (1, 0, 2)).reshape(
        n_views * bsz, dim).astype(jnp.float32)
    if contrast_mode == 'one':
        anchor_feature = features[:, 0].astype(jnp.float32)
        anchor_count = 1
    else:
        anchor_feature = contrast_feature
        anchor_count = contrast_count
    adc = (anchor_feature @ contrast_feature.T) / temperature
    logits = adc - jnp.max(adc, axis=1, keepdims=True)
    mask = jnp.tile(mask, (anchor_count, contrast_count))
    M, N = mask.shape
    logits_mask = 1.0 - jnp.eye(M, N, dtype=jnp.float32)
    mask = mask * logits_mask
    exp_logits = jnp.exp(logits) * logits_mask
    log_prob = logits - jnp.log(exp_logits.sum(1, keepdims=True))
    mean_log_prob_pos = (mask * log_prob).sum(1) / mask.sum(1)
    loss = -(temperature / base_temperature) * mean_log_prob_pos
    return loss.reshape(anchor_count, bsz).mean()


if __name__ == "__main__":
    key = jax.random.PRNGKey(0)
    k1, k2 = jax.random.split(key)

    bsz, n_views, dim = 8, 2, 32
    features = jax.random.normal(k1, (bsz, n_views, dim), dtype=jnp.float32)
    # L2-normalize features (standard SupCon usage); semantics unchanged.
    features = features / jnp.linalg.norm(features, axis=-1, keepdims=True)
    labels = jax.random.randint(k2, (bsz,), 0, 3)

    # Supervised (labels) path, 'all' mode.
    loss_sup = supcon_loss(features, labels=labels)
    jax.block_until_ready(loss_sup)
    ref_sup = _supcon_loss_ref(features, labels=labels)

    # Unsupervised SimCLR path (labels=None, mask=None).
    loss_unsup = supcon_loss(features)
    jax.block_until_ready(loss_unsup)
    ref_unsup = _supcon_loss_ref(features, labels=None)

    # 'one' contrast mode.
    loss_one = supcon_loss(features, labels=labels, contrast_mode='one')
    jax.block_until_ready(loss_one)
    ref_one = _supcon_loss_ref(features, labels=labels, contrast_mode='one')

    # bf16 feature path (full-rate MXU); looser tolerance vs f32 reference.
    loss_bf16 = supcon_loss(features, labels=labels,
                            compute_dtype=jnp.bfloat16)
    jax.block_until_ready(loss_bf16)

    assert jnp.allclose(loss_sup, ref_sup, atol=1e-3, rtol=1e-3), (loss_sup, ref_sup)
    assert jnp.allclose(loss_unsup, ref_unsup, atol=1e-3, rtol=1e-3), (loss_unsup, ref_unsup)
    assert jnp.allclose(loss_one, ref_one, atol=1e-3, rtol=1e-3), (loss_one, ref_one)
    assert jnp.allclose(loss_bf16, ref_sup, atol=1e-1, rtol=1e-1), (loss_bf16, ref_sup)

    print("KERNEL_OK")
</pallas_src>

<mosaic_0001>
module attributes {stable_mosaic.version = 11 : i64} {
  func.func @_supcon_kernel(%arg0: i32, %arg1: i32, %arg2: memref<8x128xf32, #tpu.memory_space<vmem>>, %arg3: memref<128x128xf32, #tpu.memory_space<vmem>>, %arg4: memref<8x1xi32, #tpu.memory_space<vmem>>, %arg5: memref<1x128xi32, #tpu.memory_space<vmem>>, %arg6: memref<8x1xf32, #tpu.memory_space<vmem>>, %arg7: memref<8x1xf32, #tpu.memory_space<vmem>>, %arg8: memref<8x1xf32, #tpu.memory_space<vmem>>, %arg9: memref<8x1xf32, #tpu.memory_space<vmem>>, %arg10: memref<8x1xf32, #tpu.memory_space<vmem>>) attributes {dimension_semantics = [#tpu.dimension_semantics<parallel>, #tpu.dimension_semantics<arbitrary>], iteration_bounds = array<i64: 2, 1>, scalar_prefetch = 0 : i64, scratch_operands = 4 : i64, tpu.core_type = #tpu.core_type<tc>, window_params = [{transform_indices = @transform_0, window_bounds = array<i64: 8, 128>}, {transform_indices = @transform_1, window_bounds = array<i64: 128, 128>}, {transform_indices = @transform_2, window_bounds = array<i64: 8, 1>}, {transform_indices = @transform_3, window_bounds = array<i64: 1, 128>}, {transform_indices = @transform_4, window_bounds = array<i64: 8, 1>}]} {
    %c0_i32 = arith.constant 0 : i32
    %0 = arith.cmpi eq, %arg1, %c0_i32 : i32
    %1 = arith.extui %0 : i1 to i32
    %c0_i32_0 = arith.constant 0 : i32
    %2 = arith.cmpi ne, %1, %c0_i32_0 : i32
    scf.if %2 {
      %cst_34 = arith.constant 0xFF800000 : f32
      %64 = vector.broadcast %cst_34 : f32 to vector<8x1xf32>
      %c0_35 = arith.constant 0 : index
      %c0_36 = arith.constant 0 : index
      %65 = vector.load %arg7[%c0_35, %c0_36] : memref<8x1xf32, #tpu.memory_space<vmem>>, vector<8x1xf32>
      tpu.vector_store %arg7[%c0_35, %c0_36], %64 {strides = array<i32>} : memref<8x1xf32, #tpu.memory_space<vmem>>, vector<8x1xf32>,
      %cst_37 = arith.constant 0.000000e+00 : f32
      %66 = vector.broadcast %cst_37 : f32 to vector<8x1xf32>
      %c0_38 = arith.constant 0 : index
      %c0_39 = arith.constant 0 : index
      %67 = vector.load %arg8[%c0_38, %c0_39] : memref<8x1xf32, #tpu.memory_space<vmem>>, vector<8x1xf32>
      tpu.vector_store %arg8[%c0_38, %c0_39], %66 {strides = array<i32>} : memref<8x1xf32, #tpu.memory_space<vmem>>, vector<8x1xf32>,
      %cst_40 = arith.constant 0.000000e+00 : f32
      %68 = vector.broadcast %cst_40 : f32 to vector<8x1xf32>
      %c0_41 = arith.constant 0 : index
      %c0_42 = arith.constant 0 : index
      %69 = vector.load %arg9[%c0_41, %c0_42] : memref<8x1xf32, #tpu.memory_space<vmem>>, vector<8x1xf32>
      tpu.vector_store %arg9[%c0_41, %c0_42], %68 {strides = array<i32>} : memref<8x1xf32, #tpu.memory_space<vmem>>, vector<8x1xf32>,
      %cst_43 = arith.constant 0.000000e+00 : f32
      %70 = vector.broadcast %cst_43 : f32 to vector<8x1xf32>
      %c0_44 = arith.constant 0 : index
      %c0_45 = arith.constant 0 : index
      %71 = vector.load %arg10[%c0_44, %c0_45] : memref<8x1xf32, #tpu.memory_space<vmem>>, vector<8x1xf32>
      tpu.vector_store %arg10[%c0_44, %c0_45], %70 {strides = array<i32>} : memref<8x1xf32, #tpu.memory_space<vmem>>, vector<8x1xf32>,
    } else {
    }
    %c0 = arith.constant 0 : index
    %c0_1 = arith.constant 0 : index
    %3 = vector.load %arg2[%c0, %c0_1] : memref<8x128xf32, #tpu.memory_space<vmem>>, vector<8x128xf32>
    %c0_2 = arith.constant 0 : index
    %c0_3 = arith.constant 0 : index
    %4 = vector.load %arg3[%c0_2, %c0_3] : memref<128x128xf32, #tpu.memory_space<vmem>>, vector<128x128xf32>
    %cst = arith.constant dense<0.000000e+00> : vector<8x128xf32>
    %5 = tpu.matmul %3, %4, %cst {dimension_numbers = #tpu.dot_dimension_numbers<[1], [0], [0], [1], [0, 0, 1, 1], [], []>} : vector<8x128xf32>, vector<128x128xf32>, vector<8x128xf32> -> vector<8x128xf32>
    %c0_4 = arith.constant 0 : index
    %c0_5 = arith.constant 0 : index
    %6 = vector.load %arg4[%c0_4, %c0_5] : memref<8x1xi32, #tpu.memory_space<vmem>>, vector<8x1xi32>
    %c0_6 = arith.constant 0 : index
    %c0_7 = arith.constant 0 : index
    %7 = vector.load %arg5[%c0_6, %c0_7] : memref<1x128xi32, #tpu.memory_space<vmem>>, vector<1x128xi32>
    %c-2147483647_i32 = arith.constant -2147483647 : i32
    %8 = vector.broadcast %c-2147483647_i32 : i32 to vector<1x128xi32>
    %9 = arith.cmpi eq, %7, %8 : vector<1x128xi32>
    %cst_8 = arith.constant -1.000000e+30 : f32
    %10 = vector.shape_cast %9 : vector<1x128xi1> to vector<1x128xi1>
    %11 = vector.broadcast %10 : vector<1x128xi1> to vector<8x128xi1>
    %12 = vector.broadcast %cst_8 : f32 to vector<8x128xf32>
    %13 = arith.select %11, %12, %5 : vector<8x128xi1>, vector<8x128xf32>
    %cst_9 = arith.constant dense<0xFF800000> : vector<8xf32>
    %14 = vector.multi_reduction <maximumf>, %13, %cst_9 [1] : vector<8x128xf32> to vector<8xf32>
    %15 = vector.shape_cast %14 : vector<8xf32> to vector<8x1xf32>
    %c0_10 = arith.constant 0 : index
    %c0_11 = arith.constant 0 : index
    %16 = vector.load %arg7[%c0_10, %c0_11] : memref<8x1xf32, #tpu.memory_space<vmem>>, vector<8x1xf32>
    %17 = arith.maximumf %16, %15 : vector<8x1xf32>
    %c0_12 = arith.constant 0 : index
    %c0_13 = arith.constant 0 : index
    %18 = vector.load %arg7[%c0_12, %c0_13] : memref<8x1xf32, #tpu.memory_space<vmem>>, vector<8x1xf32>
    %19 = arith.subf %18, %17 : vector<8x1xf32>
    %20 = math.exp %19 : vector<8x1xf32>
    %c8_i32 = arith.constant 8 : i32
    %21 = arith.muli %arg0, %c8_i32 : i32
    %22 = tpu.iota {dimensions = array<i32: 0>} : vector<8x1xi32>
    %23 = vector.broadcast %21 : i32 to vector<8x1xi32>
    %24 = arith.addi %23, %22 : vector<8x1xi32>
    %c128_i32 = arith.constant 128 : i32
    %25 = arith.muli %arg1, %c128_i32 : i32
    %26 = tpu.iota {dimensions = array<i32: 1>} : vector<1x128xi32>
    %27 = vector.broadcast %25 : i32 to vector<1x128xi32>
    %28 = arith.addi %27, %26 : vector<1x128xi32>
    %29 = vector.broadcast %24 : vector<8x1xi32> to vector<8x128xi32>
    %30 = vector.broadcast %28 : vector<1x128xi32> to vector<8x128xi32>
    %31 = arith.cmpi ne, %29, %30 : vector<8x128xi32>
    %32 = vector.broadcast %17 : vector<8x1xf32> to vector<8x128xf32>
    %33 = arith.subf %13, %32 : vector<8x128xf32>
    %34 = math.exp %33 : vector<8x128xf32>
    %cst_14 = arith.constant 0.000000e+00 : f32
    %35 = vector.broadcast %cst_14 : f32 to vector<8x128xf32>
    %36 = arith.select %31, %34, %35 : vector<8x128xi1>, vector<8x128xf32>
    %37 = vector.broadcast %6 : vector<8x1xi32> to vector<8x128xi32>
    %38 = vector.broadcast %7 : vector<1x128xi32> to vector<8x128xi32>
    %39 = arith.cmpi eq, %37, %38 : vector<8x128xi32>
    %40 = arith.andi %39, %31 : vector<8x128xi1>
    %41 = arith.extui %40 : vector<8x128xi1> to vector<8x128xi32>
    %42 = arith.sitofp %41 : vector<8x128xi32> to vector<8x128xf32>
    %c0_15 = arith.constant 0 : index
    %c0_16 = arith.constant 0 : index
    %43 = vector.load %arg8[%c0_15, %c0_16] : memref<8x1xf32, #tpu.memory_space<vmem>>, vector<8x1xf32>
    %44 = arith.mulf %20, %43 : vector<8x1xf32>
    %cst_17 = arith.constant dense<0.000000e+00> : vector<8xf32>
    %45 = vector.multi_reduction <add>, %36, %cst_17 [1] : vector<8x128xf32> to vector<8xf32>
    %46 = vector.shape_cast %45 : vector<8xf32> to vector<8x1xf32>
    %47 = arith.addf %44, %46 : vector<8x1xf32>
    %c0_18 = arith.constant 0 : index
    %c0_19 = arith.constant 0 : index
    %48 = vector.load %arg8[%c0_18, %c0_19] : memref<8x1xf32, #tpu.memory_space<vmem>>, vector<8x1xf32>
    tpu.vector_store %arg8[%c0_18, %c0_19], %47 {strides = array<i32>} : memref<8x1xf32, #tpu.memory_space<vmem>>, vector<8x1xf32>,
    %c0_20 = arith.constant 0 : index
    %c0_21 = arith.constant 0 : index
    %49 = vector.load %arg9[%c0_20, %c0_21] : memref<8x1xf32, #tpu.memory_space<vmem>>, vector<8x1xf32>
    %50 = arith.mulf %42, %13 : vector<8x128xf32>
    %cst_22 = arith.constant dense<0.000000e+00> : vector<8xf32>
    %51 = vector.multi_reduction <add>, %50, %cst_22 [1] : vector<8x128xf32> to vector<8xf32>
    %52 = vector.shape_cast %51 : vector<8xf32> to vector<8x1xf32>
    %53 = arith.addf %49, %52 : vector<8x1xf32>
    %c0_23 = arith.constant 0 : index
    %c0_24 = arith.constant 0 : index
    %54 = vector.load %arg9[%c0_23, %c0_24] : memref<8x1xf32, #tpu.memory_space<vmem>>, vector<8x1xf32>
    tpu.vector_store %arg9[%c0_23, %c0_24], %53 {strides = array<i32>} : memref<8x1xf32, #tpu.memory_space<vmem>>, vector<8x1xf32>,
    %c0_25 = arith.constant 0 : index
    %c0_26 = arith.constant 0 : index
    %55 = vector.load %arg10[%c0_25, %c0_26] : memref<8x1xf32, #tpu.memory_space<vmem>>, vector<8x1xf32>
    %cst_27 = arith.constant dense<0.000000e+00> : vector<8xf32>
    %56 = vector.multi_reduction <add>, %42, %cst_27 [1] : vector<8x128xf32> to vector<8xf32>
    %57 = vector.shape_cast %56 : vector<8xf32> to vector<8x1xf32>
    %58 = arith.addf %55, %57 : vector<8x1xf32>
    %c0_28 = arith.constant 0 : index
    %c0_29 = arith.constant 0 : index
    %59 = vector.load %arg10[%c0_28, %c0_29] : memref<8x1xf32, #tpu.memory_space<vmem>>, vector<8x1xf32>
    tpu.vector_store %arg10[%c0_28, %c0_29], %58 {strides = array<i32>} : memref<8x1xf32, #tpu.memory_space<vmem>>, vector<8x1xf32>,
    %c0_30 = arith.constant 0 : index
    %c0_31 = arith.constant 0 : index
    %60 = vector.load %arg7[%c0_30, %c0_31] : memref<8x1xf32, #tpu.memory_space<vmem>>, vector<8x1xf32>
    tpu.vector_store %arg7[%c0_30, %c0_31], %17 {strides = array<i32>} : memref<8x1xf32, #tpu.memory_space<vmem>>, vector<8x1xf32>,
    %c0_i32_32 = arith.constant 0 : i32
    %61 = arith.cmpi eq, %arg1, %c0_i32_32 : i32
    %62 = arith.extui %61 : i1 to i32
    %c0_i32_33 = arith.constant 0 : i32
    %63 = arith.cmpi ne, %62, %c0_i32_33 : i32
    scf.if %63 {
      %c0_34 = arith.constant 0 : index
      %c0_35 = arith.constant 0 : index
      %64 = vector.load %arg9[%c0_34, %c0_35] : memref<8x1xf32, #tpu.memory_space<vmem>>, vector<8x1xf32>
      %c0_36 = arith.constant 0 : index
      %c0_37 = arith.constant 0 : index
      %65 = vector.load %arg10[%c0_36, %c0_37] : memref<8x1xf32, #tpu.memory_space<vmem>>, vector<8x1xf32>
      %66 = arith.divf %64, %65 : vector<8x1xf32>
      %c0_38 = arith.constant 0 : index
      %c0_39 = arith.constant 0 : index
      %67 = vector.load %arg7[%c0_38, %c0_39] : memref<8x1xf32, #tpu.memory_space<vmem>>, vector<8x1xf32>
      %68 = arith.subf %66, %67 : vector<8x1xf32>
      %c0_40 = arith.constant 0 : index
      %c0_41 = arith.constant 0 : index
      %69 = vector.load %arg8[%c0_40, %c0_41] : memref<8x1xf32, #tpu.memory_space<vmem>>, vector<8x1xf32>
      %70 = math.log %69 : vector<8x1xf32>
      %71 = arith.subf %68, %70 : vector<8x1xf32>
      %cst_42 = arith.constant -1.000000e+00 : f32
      %72 = vector.broadcast %cst_42 : f32 to vector<8x1xf32>
      %73 = arith.mulf %72, %71 : vector<8x1xf32>
      %c0_43 = arith.constant 0 : index
      %c0_44 = arith.constant 0 : index
      %74 = vector.load %arg6[%c0_43, %c0_44] : memref<8x1xf32, #tpu.memory_space<vmem>>, vector<8x1xf32>
      tpu.vector_store %arg6[%c0_43, %c0_44], %73 {strides = array<i32>} : memref<8x1xf32, #tpu.memory_space<vmem>>, vector<8x1xf32>,
    } else {
    }
    return
  }
  func.func @transform_0(%arg0: i32, %arg1: i32) -> (i32, i32) {
    %c0_i32 = arith.constant 0 : i32
    %c0_i32_0 = arith.constant 0 : i32
    return %arg0, %c0_i32 : i32, i32
  }
  func.func @transform_1(%arg0: i32, %arg1: i32) -> (i32, i32) {
    %c0_i32 = arith.constant 0 : i32
    %c0_i32_0 = arith.constant 0 : i32
    return %c0_i32, %arg1 : i32, i32
  }
  func.func @transform_2(%arg0: i32, %arg1: i32) -> (i32, i32) {
    %c0_i32 = arith.constant 0 : i32
    %c0_i32_0 = arith.constant 0 : i32
    return %arg0, %c0_i32 : i32, i32
  }
  func.func @transform_3(%arg0: i32, %arg1: i32) -> (i32, i32) {
    %c0_i32 = arith.constant 0 : i32
    %c0_i32_0 = arith.constant 0 : i32
    return %c0_i32, %arg1 : i32, i32
  }
  func.func @transform_4(%arg0: i32, %arg1: i32) -> (i32, i32) {
    %c0_i32 = arith.constant 0 : i32
    %c0_i32_0 = arith.constant 0 : i32
    return %arg0, %c0_i32 : i32, i32
  }
}

</mosaic_0001>

<bundles_post_ra>
// kernel: tpu_custom_call.1
= control target key start
LH: loop header
LB: loop body
LE: loop exit
PB: predicated region body
PF: predicated region fallthrough
CT: control target
= control target key end

     0   :  { %9 = vsyncpa [#allocation7], 0  ;;  %s768_s15 = smov 0   ;;  %s770_s16 = smov 0   ;;  %s875_s0 = inlined_call_operand.vmem [shape: f32[16,128], index: 0, kind: input, shape index: {}]   ;;  %s876_s1 = inlined_call_operand.hbm [shape: f32[128,128], index: 1, kind: input, shape index: {}]   ;;  %s877_s2 = inlined_call_operand.vmem [shape: s32[16,1], index: 2, kind: input, shape index: {}]   ;;  %s878_s3 = inlined_call_operand.vmem [shape: s32[1,128], index: 3, kind: input, shape index: {}]   ;;  %s879_s4 = inlined_call_operand.vmem [shape: f32[16,1], index: 4, kind: output, shape index: {}]  }
   0x1   :  { %s772_s17 = smov 0  }
   0x2 LB: > { %s536_s18 = sadd.s32 4294967295, %s733_s17   ;;  %s27_s19 = sadd.s32 1, %s729_s16  ;;  %s733_s17 = sphi %s772_s17, %s15_s17   ;;  %s729_s16 = sphi %s770_s16, %s889_s16   ;;  %s725_s15 = sphi %s768_s15, %s888_s15  }
   0x3   : > { %p29_p0 = scmp.ge.s32.totalorder %s27_s19, 2  ;;  %p538_p1 = scmp.ge.s32.totalorder %s733_s17, 1 }
   0x4   : > { %p162_p2 = scmp.lt.s32.totalorder %s733_s17, 3  ;;  %p793_p4 = scmp.eq.s32.totalorder %s536_s18, 0 }
   0x5   : > { %s891_s19 = smov (%p29_p0, %s27_s19), 0  ;;  %s735_s22 = smov [#allocation6]  }
   0x6   : > { %p789_p3 = pnand %p538_p1, %p162_p2  ;;  %s176_s23 = sshll.u32 %s735_s22, 4  ;;  %s177_s23 = int_to_ptr.vmem [resolvable:$true] %s176_s23 }
   0x7   : > { %s884_s21 = scalar_select %p793_p4, 1, 0 }
   0x8   : > { %s883_s20 = scalar_select %p789_p3, 1, 0 }
   0x9   : > { %p631_p5 = pneg %p789_p3  ;;  %s679_s27 = scalar_lea.hbm %s876_s1, 2048 }
   0xa   : > { %p680_p7 = scmp.ne.s32.totalorder %s876_s1, %s679_s27  ;;  %p686_p11 = scmp.lt.u32.totalorder %s679_s27, %s876_s1 }
   0xb   : > { %p801_p6 = pnand %p793_p4, %p631_p5 }
   0xd   : > { %p681_p8 = pneg %p801_p6 }
   0xf   : > { %p682_p9 = pnand %p681_p8, %p680_p7 }
  0x11   : > { %p683_p10 = pneg %p682_p9 }
  0x13   : > { %p688_p12 = pnand %p686_p11, %p683_p10 }
  0x15   : > { %691 = shalt.err (!%p688_p12)
}
  0x16   : > { %s692_s6 = scalar_lea.vmem %s177_s23, 2048  ;;  %p700_p2 = scmp.lt.s32.totalorder %s177_s23, %s177_s23 }
  0x17   : > { %p693_p13 = scmp.ne.s32.totalorder %s177_s23, %s692_s6  ;;  %p701_p5 = scmp.lt.s32.totalorder %s692_s6, %s692_s6 }
  0x19   : > { %p695_p0 = pnand %p693_p13, %p681_p8  ;;  %p702_p4 = por %p701_p5, %p700_p2 }
  0x1b   : > { %p696_p1 = pneg %p695_p0 }
  0x1d   : > { %p703_p3 = pnand %p702_p4, %p696_p1 }
  0x1f   : > { %706 = shalt.err (!%p703_p3)
}
  0x20   : > { %s736_s7 = smov 128   ;;  %s737_s8 = smov 8  }
  0x21   : > { %634 = dma.hbm_to_vmem [thread:$0]  (!%p801_p6), %s876_s1, 2048, %s177_s23, [#allocation7], %s736_s7, %s736_s7, %s737_s8  }
  0x22   : > { %p886_p7 = scmp.ne.s32.totalorder %s883_s20, 0 }
  0x23   : > { %p887_p9 = scmp.ne.s32.totalorder (!%p886_p7), %s884_s21, 0 }
  0x24   : > { %212 = sbr.rel (%p886_p7) target bundleno = 750 (0x2ee), region = 36 }
  0x2b   : > { %720 = dma.done.wait (%p887_p9), [#allocation7], 2048  }
  0x2c   : > { %722 = vsyncadd (%p887_p9), [#allocation7], 4294965248  ;;  %vm262_vm0 = vcmask 7168   ;;  %v738_v0 = vmov 0.0|0.0   ;;  %v739_v1 = vmov 0.0   ;;  %vm740_vm1 = vmmov 0  }
  0x2d   : > { %603 = vmatprep.subr.bf16.mxu0 %v738_v0  ;;  %264 = vst.msk [vmem:[#allocation3] sm:$0xff] %vm262_vm0, %v739_v1  ;;  %265 = vst.msk [vmem:[#allocation4] sm:$0xff] %vm262_vm0, %v739_v1  ;;  %600 = vmatprep.mubr.msk.f32.mxu0 %vm740_vm1, %v739_v1  ;;  %p243_p3 = scmp.lt.s32.totalorder %s725_s15, 1  ;;  %v741_v2 = vmov 0   ;;  %v268_v3 = vld [vmem:[#allocation6] sm:$0xff]  ;;  %v269_v4 = vld [vmem:[#allocation6 + $0x8] sm:$0xff]  ;;  %v358_v29 = vlaneseq }
  0x2e   : > { %266 = vst.msk [vmem:[#allocation5] sm:$0xff] %vm262_vm0, %v739_v1  ;;  %670 = vset.pattern.permute.xlu1 %v741_v2  ;;  %669 = vset.pattern.permute.xlu0 %v741_v2  ;;  %v270_v5 = vld [vmem:[#allocation6 + $0x10] sm:$0xff]  ;;  %v604_v6 = vpack.c.bf16 %v269_v4, %v268_v3  ;;  %v271_v7 = vld [vmem:[#allocation6 + $0x18] sm:$0xff]  ;;  %v272_v9 = vld [vmem:[#allocation6 + $0x20] sm:$0xff]  ;;  %v742_v30 = vmov -inf   ;;  %s547_s23 = sshll.u32 %s725_s15, 3 }
  0x2f   : > { %s244_s11 = scalar_select %p243_p3, %s725_s15, 1  ;;  %v607_v8 = vpack.c.bf16 %v271_v7, %v270_v5  ;;  %v273_v10 = vld [vmem:[#allocation6 + $0x28] sm:$0xff]  ;;  %v274_v13 = vld [vmem:[#allocation6 + $0x30] sm:$0xff]  ;;  %v275_v14 = vld [vmem:[#allocation6 + $0x38] sm:$0xff]  ;;  %263 = vst.msk [vmem:[#allocation2] sm:$0xff] %vm262_vm0, %v742_v30  ;;  %v359_v31 = vshrl.u32 %v358_v29, 7  ;;  %v374_v32 = vstv %s547_s23 }
  0x30   : > { %605 = vmatpush3.bf16.msra.mxu0 %v604_v6  ;;  %v610_v12 = vpack.c.bf16 %v273_v10, %v272_v9  ;;  %v613_v15 = vpack.c.bf16 %v275_v14, %v274_v13  ;;  %v276_v16 = vld [vmem:[#allocation6 + $0x40] sm:$0xff]  ;;  %v277_v17 = vld [vmem:[#allocation6 + $0x48] sm:$0xff]  ;;  %v278_v19 = vld [vmem:[#allocation6 + $0x50] sm:$0xff]  ;;  %v378_v36 = vand.u32 127, %v358_v29 }
  0x31   : > { %s838_s12 = sshll.u32 %s244_s11, 3  ;;  %606 = vmatprep.subr.bf16.mxu0 %v738_v0  ;;  %v616_v18 = vpack.c.bf16 %v277_v17, %v276_v16  ;;  %v279_v20 = vld [vmem:[#allocation6 + $0x58] sm:$0xff]  ;;  %v280_v22 = vld [vmem:[#allocation6 + $0x60] sm:$0xff]  ;;  %v281_v23 = vld [vmem:[#allocation6 + $0x68] sm:$0xff]  ;;  %v360_v33 = vsub.s32 0, %v359_v31  ;;  %v375_v35 = vadd.s32 %v374_v32, %v359_v31 }
  0x32   : > { %s250_s18 = scalar_lea.vmem %s877_s2, %s838_s12  ;;  %v619_v21 = vpack.c.bf16 %v279_v20, %v278_v19  ;;  %v622_v24 = vpack.c.bf16 %v281_v23, %v280_v22  ;;  %v282_v25 = vld [vmem:[#allocation6 + $0x70] sm:$0xff]  ;;  %v283_v26 = vld [vmem:[#allocation6 + $0x78] sm:$0xff]  ;;  %s246_s22 = scalar_lea.vmem %s875_s0, %s838_s12  ;;  %v355_v34 = vld [vmem:[%s878_s3] sm:$0x1] }
  0x33   : > { %v354_v11 = vld [vmem:[%s250_s18] sm:$0xff]  ;;  %v625_v27 = vpack.c.bf16 %v283_v26, %v282_v25  ;;  %v397_v37 = vrot.slane %v355_v34, %v360_v33  ;;  %vm381_vm2 = vcmp.ne.s32.totalorder %v375_v35, %v378_v36  ;;  %vm356_vm5 = vcmp.eq.s32.totalorder %v355_v34, 2147483649  ;;  %s257_s27 = scalar_lea.vmem %s879_s4, %s838_s12 }
  0x34   : > { %392 = vperm.xlu1 %670, %v354_v11   ;;  %608 = vmatpush3.bf16.msra.mxu0 %v607_v8  ;;  %v267_v28 = vld [vmem:[%s246_s22] sm:$0xff]  ;;  %v357_v40 = vsel %vm356_vm5, 1, %v741_v2  ;;  %v402_v60 = vld [vmem:[#allocation3] sm:$0xff] }
  0x35   : > { %609 = vmatprep.subr.bf16.mxu0 %v738_v0  ;;  %v361_v41 = vrot.slane %v357_v40, %v360_v33  ;;  %v415_v50 = vld [vmem:[#allocation5] sm:$0xff] }
  0x36   : > { %v366_v45 = vld [vmem:[#allocation2] sm:$0xff] }
  0x37   : > { %vm362_vm6 = vcmp.eq.s32.totalorder %v361_v41, 1 }
  0x38   : > { %611 = vmatpush3.bf16.msra.mxu0 %v610_v12 }
  0x39   : > { %612 = vmatprep.subr.bf16.mxu0 %v738_v0 }
  0x3c   : > { %614 = vmatpush3.bf16.msra.mxu0 %v613_v15 }
  0x3d   : > { %615 = vmatprep.subr.bf16.mxu0 %v738_v0 }
  0x40   : > { %617 = vmatpush3.bf16.msra.mxu0 %v616_v18 }
  0x41   : > { %618 = vmatprep.subr.bf16.mxu0 %v738_v0 }
  0x44   : > { %620 = vmatpush3.bf16.msra.mxu0 %v619_v21 }
  0x45   : > { %621 = vmatprep.subr.bf16.mxu0 %v738_v0 }
  0x48   : > { %623 = vmatpush3.bf16.msra.mxu0 %v622_v24 }
  0x49   : > { %624 = vmatprep.subr.bf16.mxu0 %v738_v0 }
  0x4c   : > { %626 = vmatpush3.bf16.msra.mxu0 %v625_v27 }
  0x4f   : > { %601 = vmatmul.mubr.f32.vlgmr.msra.gmra.mrb[0].mxu0 %v267_v28 }
  0xb3   : > { %v393_v38 = vpop.permute.xlu1 %392 }
  0xb4   : > { %vm398_vm3 = vcmp.eq.s32.totalorder %v393_v38, %v397_v37 }
  0xb5   : > { %vm399_vm4 = vmand %vm398_vm3, %vm381_vm2 }
  0xb6   : > { %v548_v39 = vsel %vm399_vm4, 1.0, %v739_v1  ;;  %v409_v1 = vld [vmem:[#allocation4] sm:$0xff] }
  0xb7   : > { %416 = vadd.xlane.f32.xlu1 %v548_v39 }
 0x122   : > { %v350_v42 = vpop.f32.mrb[0].mxu0 }
 0x123   : > { %v363_v43 = vsel %vm362_vm6, -1e+30, %v350_v42  ;;  %v602_v44 = vpop.f32.mrb[1].mxu0 }
 0x124   : > { %364 = vmax.xlane.f32.xlu0 %v363_v43  ;;  %v410_v57 = vmul.f32 %v548_v39, %v363_v43 }
 0x144   : > { %v417_v49 = vpop.xlane.xlu1 %416 }
 0x145   : > { %v418_v51 = vadd.f32 %v417_v49, %v415_v50 }
 0x147   : > { %419 = vst.msk [vmem:[#allocation5] sm:$0xff] %vm262_vm0, %v418_v51 }
 0x14e   : > { %v425_v0 = vld [vmem:[#allocation5] sm:$0xff] }
 0x1b1   : > { %v365_v46 = vpop.xlane.xlu0 %364 }
 0x1b2   : > { %v367_v47 = vmax.f32 %v366_v45, %v365_v46 }
 0x1b4   : > { %v368_v48 = vsub.f32 %v366_v45, %v367_v47  ;;  %420 = vst.msk [vmem:[#allocation2] sm:$0xff] %vm262_vm0, %v367_v47  ;;  %384 = vperm.xlu0 %669, %v367_v47  }
 0x1b6   : > { %v369_v58 = vmul.f32 1.442695, %v368_v48 }
 0x1bb   : > { %v428_v9 = vld [vmem:[#allocation2] sm:$0xff] }
 0x233   : > { %v385_v52 = vpop.permute.xlu0 %384 }
 0x234   : > { %v387_v53 = vsub.f32 %v363_v43, %v385_v52 }
 0x236   : > { %v388_v54 = vmul.f32 1.442695, %v387_v53 }
 0x238   : > { %671 = vpow2.f32 %v388_v54 }
 0x239   : > { %673 = vpow2.f32 %v369_v58 }
 0x23a   : > { %675 = vrcp.f32 %v425_v0 }
 0x242   : > { %v672_v55 = vpop.eup %671 }
 0x243   : > { %v390_v56 = vsel %vm381_vm2, %v672_v55, 0.0  ;;  %v674_v59 = vpop.eup %673 }
 0x244   : > { %404 = vadd.xlane.f32.xlu1 %v390_v56  ;;  %v403_v61 = vmul.f32 %v674_v59, %v402_v60  ;;  %v676_v5 = vpop.eup %675 }
 0x248   : > { %411 = vadd.xlane.f32.xlu1 %v410_v57 }
 0x2d1   : > { %v405_v62 = vpop.xlane.xlu1 %404 }
 0x2d2   : > { %v406_v63 = vadd.f32 %v405_v62, %v403_v61 }
 0x2d4   : > { %408 = vst.msk [vmem:[#allocation3] sm:$0xff] %vm262_vm0, %v406_v63 }
 0x2d5   : > { %v412_v2 = vpop.xlane.xlu1 %411 }
 0x2d6   : > { %v413_v3 = vadd.f32 %v412_v2, %v409_v1 }
 0x2d8   : > { %414 = vst.msk [vmem:[#allocation4] sm:$0xff] %vm262_vm0, %v413_v3 }
 0x2db   : > { %v430_v4 = vld [vmem:[#allocation3] sm:$0xff] }
 0x2dc   : > { %677 = vlog2.f32 %v430_v4 }
 0x2df   : > { %v424_v6 = vld [vmem:[#allocation4] sm:$0xff] }
 0x2e0   : > { %v427_v7 = vmul.f32 %v676_v5, %v424_v6 }
 0x2e2   : > { %v429_v11 = vsub.f32 %v427_v7, %v428_v9 }
 0x2e6   : > { %v678_v8 = vpop.eup %677 }
 0x2e7   : > { %v432_v10 = vmul.f32 0.6931472, %v678_v8 }
 0x2e9   : > { %v433_v12 = vsub.f32 %v429_v11, %v432_v10 }
 0x2eb   : > { %v434_v13 = vmul.f32 -1.0, %v433_v12 }
 0x2ed   : > { %435 = vst.msk [vmem:[%s257_s27] sm:$0xff] %vm262_vm0, %v434_v13 }
 0x2ee PF: > { %s15_s17 = sadd.s32 1, %s733_s17   ;;  %s888_s15 = smov %s729_s16 }
 0x2ef   : > { %p12_p4 = scmp.ge.s32.totalorder %s15_s17, 4   ;;  %s889_s16 = smov %s891_s19 }
 0x2f1   :  { %14 = sbr.rel (!%p12_p4) target bundleno = 2 (0x2), region = 86 }
 0x2f8   :  { %455 = vsyncpa [#allocation7], 1 }
 0x2f9   :  { %457 = vsyncpa [#allocation7 + $0x1], 1 }

</bundles_post_ra>
